<compile_context>
chip_gen: v7x
topology: tpu7x:2x2x1
jax: 0.10.0
libtpu: 0.0.40
codegen_flags: <defaults>
</compile_context>

<pallas_src>
import jax
import jax.numpy as jnp
from jax import lax
from jax.experimental import pallas as pl
from jax.experimental.pallas import tpu as pltpu


def _round_up(n, m):
    return ((n + m - 1) // m) * m


def _resnet_kernel(x_ref, w_in_ref, b_in_ref, w_blk_ref, b_blk_ref,
                   w_out_ref, b_out_ref, out_ref, hs_ref):
    """Whole depth-unrolled forward for one batch tile.

    x_ref     : (TB, input_dim)            f32
    w_in_ref  : (input_dim, Wp)            b_in_ref  : (1, Wp)       compute dtype
    w_blk_ref : (n_layers, Wp, Wp)         b_blk_ref : (n_layers, 1, Wp)
    w_out_ref : (Wp, Op)                   b_out_ref : (1, Op)
    out_ref   : (n_layers+1, TB, Op)       f32
    hs_ref    : ((n_layers+1)*TB, Wp)      f32 scratch (stacked activations)
    """
    n_layers = w_blk_ref.shape[0]
    tb = x_ref.shape[0]
    op = out_ref.shape[-1]
    cdt = w_in_ref.dtype  # compute dtype (f32 or bf16); accumulation is always f32

    # ---- input layer --------------------------------------------------------
    h = jnp.dot(x_ref[...].astype(cdt), w_in_ref[...],
                preferred_element_type=jnp.float32) + b_in_ref[...]
    hs_ref[0:tb, :] = h

    # ---- residual stochastic blocks (gate b == 1), stash every activation ---
    def block(i, h):
        z = jnp.dot(h.astype(cdt), w_blk_ref[i],
                    preferred_element_type=jnp.float32) + b_blk_ref[i]
        return h + jnp.maximum(z, 0.0)

    if n_layers <= 8:
        # small fixed depth: static unroll (LLO scheduler sees the whole loop)
        for i in range(n_layers):
            h = block(i, h)
            hs_ref[(i + 1) * tb:(i + 2) * tb, :] = h
    else:
        # deep configs: fori_loop bounds live ranges / code size
        def body(i, h):
            h = block(i, h)
            start = pl.multiple_of((i + 1) * tb, tb)
            hs_ref[pl.ds(start, tb), :] = h
            return h
        h = lax.fori_loop(0, n_layers, body, h)

    # ---- fused readout: ONE ((L+1)*TB, Wp) x (Wp, Op) matmul + one store ----
    out2d = jnp.dot(hs_ref[...].astype(cdt), w_out_ref[...],
                    preferred_element_type=jnp.float32) + b_out_ref[...]
    out_ref[...] = out2d.reshape(n_layers + 1, tb, op).astype(out_ref.dtype)


def arq_uncert_fc_resnet_forward(x, params, *, tb=None, compute_dtype=jnp.float32):
    """Runs forward_get_acts.  x: (batch, input_dim) float32.

    params are PyTorch-convention:
      w_in (width, input_dim), b_in (width,),
      w_blk (n_layers, width, width), b_blk (n_layers, width),
      w_out (output_dim, width), b_out (output_dim,)
    Returns (n_layers+1, batch, output_dim) float32.
    """
    w_in, b_in, w_blk, b_blk, w_out, b_out = params
    batch, input_dim = x.shape
    width = w_in.shape[0]
    n_layers = w_blk.shape[0]
    output_dim = w_out.shape[0]

    # ---- batch tile: as large as possible (multiple of 8, capped at 128) ----
    if tb is None:
        tb = min(batch, 128)
    assert tb % 8 == 0, "tb must be a multiple of 8 (f32 sublane tiling)"
    assert batch % tb == 0, "batch must be divisible by tb"

    # ---- pad feature axes to the 128-lane width (zero-pad => exact result) --
    wd = _round_up(width, 128)
    od = _round_up(output_dim, 128)

    w_in_t = jnp.zeros((input_dim, wd), jnp.float32).at[:, :width].set(w_in.T)
    b_in_p = jnp.zeros((1, wd), jnp.float32).at[0, :width].set(b_in)
    w_blk_t = jnp.zeros((n_layers, wd, wd), jnp.float32).at[:, :width, :width].set(
        jnp.transpose(w_blk, (0, 2, 1)))
    b_blk_p = jnp.zeros((n_layers, 1, wd), jnp.float32).at[:, 0, :width].set(b_blk)
    w_out_t = jnp.zeros((wd, od), jnp.float32).at[:width, :output_dim].set(w_out.T)
    b_out_p = jnp.zeros((1, od), jnp.float32).at[0, :output_dim].set(b_out)

    # cast weights once in the wrapper (activations are cast per-dot in-kernel)
    cdt = compute_dtype
    w_in_t, b_in_p = w_in_t.astype(cdt), b_in_p.astype(cdt)
    w_blk_t, b_blk_p = w_blk_t.astype(cdt), b_blk_p.astype(cdt)
    w_out_t, b_out_p = w_out_t.astype(cdt), b_out_p.astype(cdt)

    grid = (batch // tb,)

    acts_padded = pl.pallas_call(
        _resnet_kernel,
        out_shape=jax.ShapeDtypeStruct((n_layers + 1, batch, od), jnp.float32),
        grid=grid,
        in_specs=[
            pl.BlockSpec((tb, input_dim), lambda i: (i, 0)),                 # x (batch-tiled)
            pl.BlockSpec((input_dim, wd), lambda i: (0, 0)),                 # W_in^T (padded)
            pl.BlockSpec((1, wd), lambda i: (0, 0)),                         # b_in
            pl.BlockSpec((n_layers, wd, wd), lambda i: (0, 0, 0)),           # block weights^T
            pl.BlockSpec((n_layers, 1, wd), lambda i: (0, 0, 0)),            # block biases
            pl.BlockSpec((wd, od), lambda i: (0, 0)),                        # W_out^T (padded)
            pl.BlockSpec((1, od), lambda i: (0, 0)),                         # b_out
        ],
        out_specs=pl.BlockSpec((n_layers + 1, tb, od), lambda i: (0, i, 0)),
        scratch_shapes=[pltpu.VMEM(((n_layers + 1) * tb, wd), jnp.float32)],
        compiler_params=pltpu.CompilerParams(dimension_semantics=("parallel",)),
    )(x, w_in_t, b_in_p, w_blk_t, b_blk_p, w_out_t, b_out_p)

    # slice off the lane padding (layout plumbing only)
    return acts_padded[:, :, :output_dim]


def init_params(key, input_dim, output_dim, width, n_layers):
    """Deterministic PyTorch-Linear-style init (uniform +-1/sqrt(fan_in))."""
    ks = jax.random.split(key, 3)

    def lin(k, fan_in, fan_out):
        kw, kb = jax.random.split(k)
        bound = 1.0 / float(fan_in) ** 0.5
        w = jax.random.uniform(kw, (fan_out, fan_in), jnp.float32, -bound, bound)
        b = jax.random.uniform(kb, (fan_out,), jnp.float32, -bound, bound)
        return w, b

    w_in, b_in = lin(ks[0], input_dim, width)
    blk = [lin(k, width, width) for k in jax.random.split(ks[1], n_layers)]
    w_blk = jnp.stack([w for w, _ in blk])            # (n_layers, width, width)
    b_blk = jnp.stack([b for _, b in blk])            # (n_layers, width)
    w_out, b_out = lin(ks[2], width, output_dim)
    return w_in, b_in, w_blk, b_blk, w_out, b_out


def _reference_forward(x, params):
    """Pure-JAX reference of forward_get_acts for correctness checking."""
    w_in, b_in, w_blk, b_blk, w_out, b_out = params
    h = x @ w_in.T + b_in
    acts = [h @ w_out.T + b_out]
    for i in range(w_blk.shape[0]):
        h = h + jnp.maximum(h @ w_blk[i].T + b_blk[i], 0.0)
        acts.append(h @ w_out.T + b_out)
    return jnp.stack(acts, axis=0)


if __name__ == "__main__":
    input_dim, output_dim, width, n_layers = 16, 8, 32, 3
    batch = 16

    key = jax.random.PRNGKey(0)
    k_x, k_p = jax.random.split(key)
    x = jax.random.normal(k_x, (batch, input_dim), jnp.float32)
    params = init_params(k_p, input_dim, output_dim, width, n_layers)

    ref = _reference_forward(x, params)

    # f32 compute path: bit-comparable to the reference
    acts = jax.block_until_ready(arq_uncert_fc_resnet_forward(x, params))
    assert acts.shape == (n_layers + 1, batch, output_dim)
    assert jnp.allclose(acts, ref, atol=1e-5, rtol=1e-5)

    # bf16 compute path (MXU-friendly on v6e/v7x), f32 accumulation -> loose tol
    acts_bf16 = jax.block_until_ready(
        arq_uncert_fc_resnet_forward(x, params, compute_dtype=jnp.bfloat16))
    assert acts_bf16.shape == (n_layers + 1, batch, output_dim)
    assert jnp.allclose(acts_bf16, ref, atol=1e-1, rtol=1e-1)

    print("KERNEL_OK")
</pallas_src>

<mosaic_0001>
module attributes {stable_mosaic.version = 11 : i64} {
  func.func @_resnet_kernel(%arg0: i32, %arg1: memref<16x16xf32, #tpu.memory_space<vmem>>, %arg2: memref<16x128xf32, #tpu.memory_space<vmem>>, %arg3: memref<1x128xf32, #tpu.memory_space<vmem>>, %arg4: memref<3x128x128xf32, #tpu.memory_space<vmem>>, %arg5: memref<3x1x128xf32, #tpu.memory_space<vmem>>, %arg6: memref<128x128xf32, #tpu.memory_space<vmem>>, %arg7: memref<1x128xf32, #tpu.memory_space<vmem>>, %arg8: memref<4x16x128xf32, #tpu.memory_space<vmem>>, %arg9: memref<64x128xf32, #tpu.memory_space<vmem>>) attributes {dimension_semantics = [#tpu.dimension_semantics<parallel>], iteration_bounds = array<i64: 1>, scalar_prefetch = 0 : i64, scratch_operands = 1 : i64, tpu.core_type = #tpu.core_type<tc>, window_params = [{transform_indices = @transform_0, window_bounds = array<i64: 16, 16>}, {pipeline_mode = #tpu.pipeline_mode<synchronous>, transform_indices = @transform_1, window_bounds = array<i64: 16, 128>}, {pipeline_mode = #tpu.pipeline_mode<synchronous>, transform_indices = @transform_2, window_bounds = array<i64: 1, 128>}, {pipeline_mode = #tpu.pipeline_mode<synchronous>, transform_indices = @transform_3, window_bounds = array<i64: 3, 128, 128>}, {pipeline_mode = #tpu.pipeline_mode<synchronous>, transform_indices = @transform_4, window_bounds = array<i64: 3, 1, 128>}, {pipeline_mode = #tpu.pipeline_mode<synchronous>, transform_indices = @transform_5, window_bounds = array<i64: 128, 128>}, {pipeline_mode = #tpu.pipeline_mode<synchronous>, transform_indices = @transform_6, window_bounds = array<i64: 1, 128>}, {transform_indices = @transform_7, window_bounds = array<i64: 4, 16, 128>}]} {
    %c0 = arith.constant 0 : index
    %c0_0 = arith.constant 0 : index
    %0 = vector.load %arg1[%c0, %c0_0] : memref<16x16xf32, #tpu.memory_space<vmem>>, vector<16x16xf32>
    %c0_1 = arith.constant 0 : index
    %c0_2 = arith.constant 0 : index
    %1 = vector.load %arg2[%c0_1, %c0_2] : memref<16x128xf32, #tpu.memory_space<vmem>>, vector<16x128xf32>
    %cst = arith.constant dense<0.000000e+00> : vector<16x128xf32>
    %2 = tpu.matmul %0, %1, %cst {dimension_numbers = #tpu.dot_dimension_numbers<[1], [0], [0], [1], [0, 0, 1, 1], [], []>} : vector<16x16xf32>, vector<16x128xf32>, vector<16x128xf32> -> vector<16x128xf32>
    %c0_3 = arith.constant 0 : index
    %c0_4 = arith.constant 0 : index
    %3 = vector.load %arg3[%c0_3, %c0_4] : memref<1x128xf32, #tpu.memory_space<vmem>>, vector<1x128xf32>
    %4 = vector.broadcast %3 : vector<1x128xf32> to vector<16x128xf32>
    %5 = arith.addf %2, %4 : vector<16x128xf32>
    %c0_5 = arith.constant 0 : index
    %c0_6 = arith.constant 0 : index
    %6 = vector.load %arg9[%c0_5, %c0_6] : memref<64x128xf32, #tpu.memory_space<vmem>>, vector<16x128xf32>
    tpu.vector_store %arg9[%c0_5, %c0_6], %5 {strides = array<i32>} : memref<64x128xf32, #tpu.memory_space<vmem>>, vector<16x128xf32>,
    %c0_7 = arith.constant 0 : index
    %c0_8 = arith.constant 0 : index
    %c0_9 = arith.constant 0 : index
    %7 = vector.load %arg4[%c0_7, %c0_8, %c0_9] : memref<3x128x128xf32, #tpu.memory_space<vmem>>, vector<1x128x128xf32>
    %8 = vector.shape_cast %7 : vector<1x128x128xf32> to vector<128x128xf32>
    %cst_10 = arith.constant dense<0.000000e+00> : vector<16x128xf32>
    %9 = tpu.matmul %5, %8, %cst_10 {dimension_numbers = #tpu.dot_dimension_numbers<[1], [0], [0], [1], [0, 0, 1, 1], [], []>} : vector<16x128xf32>, vector<128x128xf32>, vector<16x128xf32> -> vector<16x128xf32>
    %c0_11 = arith.constant 0 : index
    %c0_12 = arith.constant 0 : index
    %c0_13 = arith.constant 0 : index
    %10 = vector.load %arg5[%c0_11, %c0_12, %c0_13] : memref<3x1x128xf32, #tpu.memory_space<vmem>>, vector<1x1x128xf32>
    %11 = vector.shape_cast %10 : vector<1x1x128xf32> to vector<1x128xf32>
    %12 = vector.broadcast %11 : vector<1x128xf32> to vector<16x128xf32>
    %13 = arith.addf %9, %12 : vector<16x128xf32>
    %cst_14 = arith.constant 0.000000e+00 : f32
    %14 = vector.broadcast %cst_14 : f32 to vector<16x128xf32>
    %15 = arith.maximumf %13, %14 : vector<16x128xf32>
    %16 = arith.addf %5, %15 : vector<16x128xf32>
    %c16 = arith.constant 16 : index
    %c0_15 = arith.constant 0 : index
    %17 = vector.load %arg9[%c16, %c0_15] : memref<64x128xf32, #tpu.memory_space<vmem>>, vector<16x128xf32>
    tpu.vector_store %arg9[%c16, %c0_15], %16 {strides = array<i32>} : memref<64x128xf32, #tpu.memory_space<vmem>>, vector<16x128xf32>,
    %c1 = arith.constant 1 : index
    %c0_16 = arith.constant 0 : index
    %c0_17 = arith.constant 0 : index
    %18 = vector.load %arg4[%c1, %c0_16, %c0_17] : memref<3x128x128xf32, #tpu.memory_space<vmem>>, vector<1x128x128xf32>
    %19 = vector.shape_cast %18 : vector<1x128x128xf32> to vector<128x128xf32>
    %cst_18 = arith.constant dense<0.000000e+00> : vector<16x128xf32>
    %20 = tpu.matmul %16, %19, %cst_18 {dimension_numbers = #tpu.dot_dimension_numbers<[1], [0], [0], [1], [0, 0, 1, 1], [], []>} : vector<16x128xf32>, vector<128x128xf32>, vector<16x128xf32> -> vector<16x128xf32>
    %c1_19 = arith.constant 1 : index
    %c0_20 = arith.constant 0 : index
    %c0_21 = arith.constant 0 : index
    %21 = vector.load %arg5[%c1_19, %c0_20, %c0_21] : memref<3x1x128xf32, #tpu.memory_space<vmem>>, vector<1x1x128xf32>
    %22 = vector.shape_cast %21 : vector<1x1x128xf32> to vector<1x128xf32>
    %23 = vector.broadcast %22 : vector<1x128xf32> to vector<16x128xf32>
    %24 = arith.addf %20, %23 : vector<16x128xf32>
    %cst_22 = arith.constant 0.000000e+00 : f32
    %25 = vector.broadcast %cst_22 : f32 to vector<16x128xf32>
    %26 = arith.maximumf %24, %25 : vector<16x128xf32>
    %27 = arith.addf %16, %26 : vector<16x128xf32>
    %c32 = arith.constant 32 : index
    %c0_23 = arith.constant 0 : index
    %28 = vector.load %arg9[%c32, %c0_23] : memref<64x128xf32, #tpu.memory_space<vmem>>, vector<16x128xf32>
    tpu.vector_store %arg9[%c32, %c0_23], %27 {strides = array<i32>} : memref<64x128xf32, #tpu.memory_space<vmem>>, vector<16x128xf32>,
    %c2 = arith.constant 2 : index
    %c0_24 = arith.constant 0 : index
    %c0_25 = arith.constant 0 : index
    %29 = vector.load %arg4[%c2, %c0_24, %c0_25] : memref<3x128x128xf32, #tpu.memory_space<vmem>>, vector<1x128x128xf32>
    %30 = vector.shape_cast %29 : vector<1x128x128xf32> to vector<128x128xf32>
    %cst_26 = arith.constant dense<0.000000e+00> : vector<16x128xf32>
    %31 = tpu.matmul %27, %30, %cst_26 {dimension_numbers = #tpu.dot_dimension_numbers<[1], [0], [0], [1], [0, 0, 1, 1], [], []>} : vector<16x128xf32>, vector<128x128xf32>, vector<16x128xf32> -> vector<16x128xf32>
    %c2_27 = arith.constant 2 : index
    %c0_28 = arith.constant 0 : index
    %c0_29 = arith.constant 0 : index
    %32 = vector.load %arg5[%c2_27, %c0_28, %c0_29] : memref<3x1x128xf32, #tpu.memory_space<vmem>>, vector<1x1x128xf32>
    %33 = vector.shape_cast %32 : vector<1x1x128xf32> to vector<1x128xf32>
    %34 = vector.broadcast %33 : vector<1x128xf32> to vector<16x128xf32>
    %35 = arith.addf %31, %34 : vector<16x128xf32>
    %cst_30 = arith.constant 0.000000e+00 : f32
    %36 = vector.broadcast %cst_30 : f32 to vector<16x128xf32>
    %37 = arith.maximumf %35, %36 : vector<16x128xf32>
    %38 = arith.addf %27, %37 : vector<16x128xf32>
    %c48 = arith.constant 48 : index
    %c0_31 = arith.constant 0 : index
    %39 = vector.load %arg9[%c48, %c0_31] : memref<64x128xf32, #tpu.memory_space<vmem>>, vector<16x128xf32>
    tpu.vector_store %arg9[%c48, %c0_31], %38 {strides = array<i32>} : memref<64x128xf32, #tpu.memory_space<vmem>>, vector<16x128xf32>,
    %c0_32 = arith.constant 0 : index
    %c0_33 = arith.constant 0 : index
    %40 = vector.load %arg9[%c0_32, %c0_33] : memref<64x128xf32, #tpu.memory_space<vmem>>, vector<64x128xf32>
    %c0_34 = arith.constant 0 : index
    %c0_35 = arith.constant 0 : index
    %41 = vector.load %arg6[%c0_34, %c0_35] : memref<128x128xf32, #tpu.memory_space<vmem>>, vector<128x128xf32>
    %cst_36 = arith.constant dense<0.000000e+00> : vector<64x128xf32>
    %42 = tpu.matmul %40, %41, %cst_36 {dimension_numbers = #tpu.dot_dimension_numbers<[1], [0], [0], [1], [0, 0, 1, 1], [], []>} : vector<64x128xf32>, vector<128x128xf32>, vector<64x128xf32> -> vector<64x128xf32>
    %c0_37 = arith.constant 0 : index
    %c0_38 = arith.constant 0 : index
    %43 = vector.load %arg7[%c0_37, %c0_38] : memref<1x128xf32, #tpu.memory_space<vmem>>, vector<1x128xf32>
    %44 = vector.broadcast %43 : vector<1x128xf32> to vector<64x128xf32>
    %45 = arith.addf %42, %44 : vector<64x128xf32>
    %46 = vector.shape_cast %45 : vector<64x128xf32> to vector<4x16x128xf32>
    %c0_39 = arith.constant 0 : index
    %c0_40 = arith.constant 0 : index
    %c0_41 = arith.constant 0 : index
    %47 = vector.load %arg8[%c0_39, %c0_40, %c0_41] : memref<4x16x128xf32, #tpu.memory_space<vmem>>, vector<4x16x128xf32>
    tpu.vector_store %arg8[%c0_39, %c0_40, %c0_41], %46 {strides = array<i32>} : memref<4x16x128xf32, #tpu.memory_space<vmem>>, vector<4x16x128xf32>,
    return
  }
  func.func @transform_0(%arg0: i32) -> (i32, i32) {
    %c0_i32 = arith.constant 0 : i32
    %c0_i32_0 = arith.constant 0 : i32
    return %arg0, %c0_i32 : i32, i32
  }
  func.func @transform_1(%arg0: i32) -> (i32, i32) {
    %c0_i32 = arith.constant 0 : i32
    %c0_i32_0 = arith.constant 0 : i32
    %c0_i32_1 = arith.constant 0 : i32
    return %c0_i32, %c0_i32_0 : i32, i32
  }
  func.func @transform_2(%arg0: i32) -> (i32, i32) {
    %c0_i32 = arith.constant 0 : i32
    %c0_i32_0 = arith.constant 0 : i32
    %c0_i32_1 = arith.constant 0 : i32
    return %c0_i32, %c0_i32_0 : i32, i32
  }
  func.func @transform_3(%arg0: i32) -> (i32, i32, i32) {
    %c0_i32 = arith.constant 0 : i32
    %c0_i32_0 = arith.constant 0 : i32
    %c0_i32_1 = arith.constant 0 : i32
    %c0_i32_2 = arith.constant 0 : i32
    return %c0_i32, %c0_i32_0, %c0_i32_1 : i32, i32, i32
  }
  func.func @transform_4(%arg0: i32) -> (i32, i32, i32) {
    %c0_i32 = arith.constant 0 : i32
    %c0_i32_0 = arith.constant 0 : i32
    %c0_i32_1 = arith.constant 0 : i32
    %c0_i32_2 = arith.constant 0 : i32
    return %c0_i32, %c0_i32_0, %c0_i32_1 : i32, i32, i32
  }
  func.func @transform_5(%arg0: i32) -> (i32, i32) {
    %c0_i32 = arith.constant 0 : i32
    %c0_i32_0 = arith.constant 0 : i32
    %c0_i32_1 = arith.constant 0 : i32
    return %c0_i32, %c0_i32_0 : i32, i32
  }
  func.func @transform_6(%arg0: i32) -> (i32, i32) {
    %c0_i32 = arith.constant 0 : i32
    %c0_i32_0 = arith.constant 0 : i32
    %c0_i32_1 = arith.constant 0 : i32
    return %c0_i32, %c0_i32_0 : i32, i32
  }
  func.func @transform_7(%arg0: i32) -> (i32, i32, i32) {
    %c0_i32 = arith.constant 0 : i32
    %c0_i32_0 = arith.constant 0 : i32
    %c0_i32_1 = arith.constant 0 : i32
    return %c0_i32, %arg0, %c0_i32_0 : i32, i32, i32
  }
}

</mosaic_0001>

<bundles_post_ra>
// kernel: tpu_custom_call.1
= control target key start
LH: loop header
LB: loop body
LE: loop exit
PB: predicated region body
PF: predicated region fallthrough
CT: control target
= control target key end

     0   :  { %12 = vsyncpa [#allocation4], 0  ;;  %s1323_s0 = inlined_call_operand.hbm [shape: f32[16,16], index: 0, kind: input, shape index: {}]   ;;  %s1324_s1 = inlined_call_operand.hbm [shape: f32[16,128], index: 1, kind: input, shape index: {}]   ;;  %s1325_s2 = inlined_call_operand.vmem [shape: f32[1,128], index: 2, kind: input, shape index: {}]   ;;  %s1326_s3 = inlined_call_operand.hbm [shape: f32[3,128,128], index: 3, kind: input, shape index: {}]   ;;  %s1327_s4 = inlined_call_operand.vmem [shape: f32[3,1,128], index: 4, kind: input, shape index: {}]   ;;  %s1328_s5 = inlined_call_operand.hbm [shape: f32[128,128], index: 5, kind: input, shape index: {}]   ;;  %s1329_s6 = inlined_call_operand.vmem [shape: f32[1,128], index: 6, kind: input, shape index: {}]   ;;  %s1330_s7 = inlined_call_operand.hbm [shape: f32[4,16,128], index: 7, kind: output, shape index: {}]  }
   0x1   :  { %13 = vsyncpa [#allocation7], 0 }
   0x2   :  { %14 = vsyncpa [#allocation10], 0 }
   0x3   :  { %15 = vsyncpa [#allocation5], 0  ;;  %s1160_s24 = smov [#allocation6]   ;;  %s1161_s26 = smov [#allocation3]  }
   0x4   :  { %s33_s25 = sshll.u32 %s1160_s24, 4  ;;  %s21_s27 = sshll.u32 %s1161_s26, 4  ;;  %s34_s25 = int_to_ptr.vmem [resolvable:$true] %s33_s25  ;;  %s1207_s27 = int_to_ptr.vmem [resolvable:$true] %s21_s27 }
   0x5   :  { %s1042_s30 = scalar_lea.hbm %s1324_s1, 256 }
   0x6   :  { %p1043_p0 = scmp.ne.s32.totalorder %s1324_s1, %s1042_s30  ;;  %p1046_p1 = scmp.lt.u32.totalorder %s1042_s30, %s1324_s1 }
   0x8   :  { %p1048_p2 = pnand %p1046_p1, %p1043_p0 }
   0xa   :  { %1051 = shalt.err (!%p1048_p2)
}
   0xb   :  { %s1052_s12 = scalar_lea.vmem %s34_s25, 256  ;;  %p1057_p4 = scmp.lt.s32.totalorder %s34_s25, %s34_s25 }
   0xc   :  { %p1053_p3 = scmp.ne.s32.totalorder %s34_s25, %s1052_s12  ;;  %p1058_p5 = scmp.lt.s32.totalorder %s1052_s12, %s1052_s12 }
   0xe   :  { %p1059_p6 = por %p1058_p5, %p1057_p4 }
  0x10   :  { %p1060_p7 = pnand %p1059_p6, %p1053_p3 }
  0x12   :  { %1063 = shalt.err (!%p1060_p7)
}
  0x13   :  { %s1162_s13 = smov 128   ;;  %s1163_s14 = smov 8  }
  0x14   :  { %39 = dma.hbm_to_vmem [thread:$0]  %s1324_s1, 256, %s34_s25, [#allocation7], %s1162_s13, %s1162_s13, %s1163_s14  }
  0x15   :  { %s1064_s19 = scalar_lea.hbm %s1323_s0, 256 }
  0x16   :  { %p1065_p8 = scmp.ne.s32.totalorder %s1323_s0, %s1064_s19  ;;  %p1068_p9 = scmp.lt.u32.totalorder %s1064_s19, %s1323_s0 }
  0x18   :  { %p1070_p10 = pnand %p1068_p9, %p1065_p8 }
  0x1a   :  { %1073 = shalt.err (!%p1070_p10)
}
  0x1b   :  { %s1074_s24 = scalar_lea.vmem %s1207_s27, 256  ;;  %p1079_p12 = scmp.lt.s32.totalorder %s1207_s27, %s1207_s27 }
  0x1c   :  { %p1075_p11 = scmp.ne.s32.totalorder %s1207_s27, %s1074_s24  ;;  %p1080_p13 = scmp.lt.s32.totalorder %s1074_s24, %s1074_s24 }
  0x1e   :  { %p1081_p0 = por %p1080_p13, %p1079_p12 }
  0x20   :  { %p1082_p1 = pnand %p1081_p0, %p1075_p11 }
  0x22   :  { %1085 = shalt.err (!%p1082_p1)
}
  0x23   :  { %27 = dma.hbm_to_vmem [thread:$0]  %s1323_s0, 256, %s1207_s27, [#allocation4], %s1162_s13, %s1162_s13, %s1163_s14  }
  0x24   :  { %s1164_s26 = smov [#allocation8]   ;;  %s1165_s29 = smov [#allocation9]  }
  0x25   :  { %s47_s28 = sshll.u32 %s1164_s26, 4  ;;  %s61_s30 = sshll.u32 %s1165_s29, 4  ;;  %s48_s28 = int_to_ptr.vmem [resolvable:$true] %s47_s28  ;;  %s1244_s30 = int_to_ptr.vmem [resolvable:$true] %s61_s30 }
  0x26   :  { %s1086_s10 = scalar_lea.hbm %s1326_s3, 6144 }
  0x27   :  { %p1087_p2 = scmp.ne.s32.totalorder %s1326_s3, %s1086_s10  ;;  %p1090_p3 = scmp.lt.u32.totalorder %s1086_s10, %s1326_s3 }
  0x29   :  { %p1092_p4 = pnand %p1090_p3, %p1087_p2 }
  0x2b   :  { %1095 = shalt.err (!%p1092_p4)
}
  0x2c   :  { %s1096_s0 = scalar_lea.vmem %s48_s28, 6144  ;;  %p1101_p6 = scmp.lt.s32.totalorder %s48_s28, %s48_s28 }
  0x2d   :  { %p1097_p5 = scmp.ne.s32.totalorder %s48_s28, %s1096_s0  ;;  %p1102_p7 = scmp.lt.s32.totalorder %s1096_s0, %s1096_s0 }
  0x2f   :  { %p1103_p8 = por %p1102_p7, %p1101_p6 }
  0x31   :  { %p1104_p9 = pnand %p1103_p8, %p1097_p5 }
  0x33   :  { %1107 = shalt.err (!%p1104_p9)
}
  0x34   :  { %53 = dma.hbm_to_vmem [thread:$0]  %s1326_s3, 6144, %s48_s28, [#allocation7], %s1162_s13, %s1162_s13, %s1163_s14  }
  0x35   :  { %s1108_s20 = scalar_lea.hbm %s1328_s5, 2048 }
  0x36   :  { %p1109_p10 = scmp.ne.s32.totalorder %s1328_s5, %s1108_s20  ;;  %p1112_p11 = scmp.lt.u32.totalorder %s1108_s20, %s1328_s5 }
  0x38   :  { %p1114_p12 = pnand %p1112_p11, %p1109_p10 }
  0x3a   :  { %1117 = shalt.err (!%p1114_p12)
}
  0x3b   :  { %s1118_s1 = scalar_lea.vmem %s1244_s30, 2048  ;;  %p1123_p0 = scmp.lt.s32.totalorder %s1244_s30, %s1244_s30 }
  0x3c   :  { %p1119_p13 = scmp.ne.s32.totalorder %s1244_s30, %s1118_s1  ;;  %p1124_p1 = scmp.lt.s32.totalorder %s1118_s1, %s1118_s1 }
  0x3e   :  { %p1125_p2 = por %p1124_p1, %p1123_p0 }
  0x40   :  { %p1126_p3 = pnand %p1125_p2, %p1119_p13 }
  0x42   :  { %1129 = shalt.err (!%p1126_p3)
}
  0x43   :  { %67 = dma.hbm_to_vmem [thread:$0]  %s1328_s5, 2048, %s1244_s30, [#allocation10], %s1162_s13, %s1162_s13, %s1163_s14  }
  0x44   :  { %1152 = dma.done.wait [#allocation4], 256  }
  0x45   :  { %1153 = vsyncadd [#allocation4], 4294967040 }
  0x46   :  { %1154 = dma.done.wait [#allocation7], 6400  }
  0x47   :  { %1155 = vsyncadd [#allocation7], 4294960896 }
  0x48   :  { %1156 = dma.done.wait [#allocation10], 2048  }
  0x49   :  { %1157 = vsyncadd [#allocation10], 4294965248  ;;  %vm93_vm0 = vcmask 130048   ;;  %v84_v0 = vld [vmem:[#allocation6] sm:$0xff]  ;;  %v85_v1 = vld [vmem:[#allocation6 + $0x8] sm:$0xff] }
  0x4a   :  { %v82_v2 = vld [vmem:[#allocation3] sm:$0xff]  ;;  %v903_v3 = vpack.c.bf16 %v85_v1, %v84_v0  ;;  %v178_v5 = vld [vmem:[#allocation8 + $0x8] sm:$0xff]  ;;  %v179_v7 = vld [vmem:[#allocation8 + $0x10] sm:$0xff] }
  0x4b   :  { %751 = vmatprep.mubr.msk.f32.mxu1 %vm93_vm0, %v82_v2  ;;  %v177_v4 = vld [vmem:[#allocation8] sm:$0xff]  ;;  %v180_v8 = vld [vmem:[#allocation8 + $0x18] sm:$0xff]  ;;  %v83_v9 = vld [vmem:[#allocation3 + $0x8] sm:$0xff] }
  0x4c   :  { %v907_v6 = vpack.c.bf16 %v178_v5, %v177_v4  ;;  %904 = vmatprep.subr.bf16.mxu1 %v903_v3  ;;  %v911_v10 = vpack.c.bf16 %v180_v8, %v179_v7  ;;  %v181_v11 = vld [vmem:[#allocation8 + $0x20] sm:$0xff]  ;;  %v182_v12 = vld [vmem:[#allocation8 + $0x28] sm:$0xff]  ;;  %v183_v14 = vld [vmem:[#allocation8 + $0x30] sm:$0xff] }
  0x4d   :  { %906 = vmatpush3.bf16.msra.mxu1 %v903_v3  ;;  %v915_v13 = vpack.c.bf16 %v182_v12, %v181_v11  ;;  %v184_v15 = vld [vmem:[#allocation8 + $0x38] sm:$0xff]  ;;  %v185_v17 = vld [vmem:[#allocation8 + $0x40] sm:$0xff]  ;;  %v186_v18 = vld [vmem:[#allocation8 + $0x48] sm:$0xff] }
  0x4e   :  { %908 = vmatprep.subr.bf16.mxu1 %v907_v6  ;;  %v919_v16 = vpack.c.bf16 %v184_v15, %v183_v14  ;;  %v923_v19 = vpack.c.bf16 %v186_v18, %v185_v17  ;;  %v187_v20 = vld [vmem:[#allocation8 + $0x50] sm:$0xff]  ;;  %v188_v21 = vld [vmem:[#allocation8 + $0x58] sm:$0xff]  ;;  %v189_v23 = vld [vmem:[#allocation8 + $0x60] sm:$0xff] }
  0x4f   :  { %v927_v22 = vpack.c.bf16 %v188_v21, %v187_v20  ;;  %v190_v24 = vld [vmem:[#allocation8 + $0x68] sm:$0xff]  ;;  %v191_v26 = vld [vmem:[#allocation8 + $0x70] sm:$0xff]  ;;  %v192_v27 = vld [vmem:[#allocation8 + $0x78] sm:$0xff] }
  0x50   :  { %752 = vmatmul.mubr.msk.f32.vlgmr.msra.gmra.mrb[0].mxu1 %vm93_vm0, %v83_v9  ;;  %v931_v25 = vpack.c.bf16 %v190_v24, %v189_v23  ;;  %v935_v28 = vpack.c.bf16 %v192_v27, %v191_v26  ;;  %v282_v29 = vld [vmem:[#allocation8 + $0x80] sm:$0xff]  ;;  %v283_v30 = vld [vmem:[#allocation8 + $0x88] sm:$0xff]  ;;  %v284_v31 = vld [vmem:[#allocation8 + $0x90] sm:$0xff] }
  0x51   :  { %910 = vmatpush3.bf16.msra.mxu1 %v907_v6  ;;  %v939_v32 = vpack.c.bf16 %v283_v30, %v282_v29  ;;  %v285_v33 = vld [vmem:[#allocation8 + $0x98] sm:$0xff]  ;;  %v286_v35 = vld [vmem:[#allocation8 + $0xa0] sm:$0xff]  ;;  %v287_v36 = vld [vmem:[#allocation8 + $0xa8] sm:$0xff] }
  0x52   :  { %912 = vmatprep.subr.bf16.mxu1 %v911_v10  ;;  %v943_v34 = vpack.c.bf16 %v285_v33, %v284_v31  ;;  %v947_v37 = vpack.c.bf16 %v287_v36, %v286_v35  ;;  %v288_v38 = vld [vmem:[#allocation8 + $0xb0] sm:$0xff]  ;;  %v289_v39 = vld [vmem:[#allocation8 + $0xb8] sm:$0xff]  ;;  %v290_v41 = vld [vmem:[#allocation8 + $0xc0] sm:$0xff] }
  0x53   :  { %940 = vmatprep.subr.bf16.mxu0 %v939_v32  ;;  %v951_v40 = vpack.c.bf16 %v289_v39, %v288_v38  ;;  %v291_v42 = vld [vmem:[#allocation8 + $0xc8] sm:$0xff]  ;;  %v292_v44 = vld [vmem:[#allocation8 + $0xd0] sm:$0xff]  ;;  %v293_v45 = vld [vmem:[#allocation8 + $0xd8] sm:$0xff] }
  0x54   :  { %942 = vmatpush3.bf16.msra.mxu0 %v939_v32  ;;  %v955_v43 = vpack.c.bf16 %v291_v42, %v290_v41  ;;  %v959_v46 = vpack.c.bf16 %v293_v45, %v292_v44  ;;  %v656_v47 = vld [vmem:[%s1325_s2] ss:$0 sm:$0xff]  ;;  %v295_v53 = vld [vmem:[#allocation8 + $0xe8] sm:$0xff]  ;;  %v296_v55 = vld [vmem:[#allocation8 + $0xf0] sm:$0xff] }
  0x55   :  { %914 = vmatpush3.bf16.msra.mxu1 %v911_v10  ;;  %944 = vmatprep.subr.bf16.mxu0 %v943_v34  ;;  %v294_v52 = vld [vmem:[#allocation8 + $0xe0] sm:$0xff]  ;;  %v297_v56 = vld [vmem:[#allocation8 + $0xf8] sm:$0xff]  ;;  %v502_v59 = vld [vmem:[#allocation9 + $0x8] sm:$0xff] }
  0x56   :  { %916 = vmatprep.subr.bf16.mxu1 %v915_v13  ;;  %v963_v54 = vpack.c.bf16 %v295_v53, %v294_v52  ;;  %v967_v57 = vpack.c.bf16 %v297_v56, %v296_v55  ;;  %v501_v58 = vld [vmem:[#allocation9] sm:$0xff]  ;;  %v389_v62 = vld [vmem:[#allocation8 + $0x108] sm:$0xff]  ;;  %v390_v63 = vld [vmem:[#allocation8 + $0x110] sm:$0xff] }
  0x57   :  { %v1003_v60 = vpack.c.bf16 %v502_v59, %v501_v58  ;;  %v388_v61 = vld [vmem:[#allocation8 + $0x100] sm:$0xff]  ;;  %v391_v1 = vld [vmem:[#allocation8 + $0x118] sm:$0xff]  ;;  %v393_v4 = vld [vmem:[#allocation8 + $0x128] sm:$0xff] }
  0x58   :  { %946 = vmatpush3.bf16.msra.mxu0 %v943_v34  ;;  %v971_v0 = vpack.c.bf16 %v389_v62, %v388_v61  ;;  %v975_v2 = vpack.c.bf16 %v391_v1, %v390_v63  ;;  %v392_v3 = vld [vmem:[#allocation8 + $0x120] sm:$0xff]  ;;  %v394_v6 = vld [vmem:[#allocation8 + $0x130] sm:$0xff]  ;;  %v395_v7 = vld [vmem:[#allocation8 + $0x138] sm:$0xff] }
  0x59   :  { %918 = vmatpush3.bf16.msra.mxu1 %v915_v13  ;;  %948 = vmatprep.subr.bf16.mxu0 %v947_v37  ;;  %v979_v5 = vpack.c.bf16 %v393_v4, %v392_v3  ;;  %v983_v8 = vpack.c.bf16 %v395_v7, %v394_v6  ;;  %v396_v9 = vld [vmem:[#allocation8 + $0x140] sm:$0xff]  ;;  %v397_v10 = vld [vmem:[#allocation8 + $0x148] sm:$0xff]  ;;  %v398_v12 = vld [vmem:[#allocation8 + $0x150] sm:$0xff] }
  0x5a   :  { %920 = vmatprep.subr.bf16.mxu1 %v919_v16  ;;  %v987_v11 = vpack.c.bf16 %v397_v10, %v396_v9  ;;  %v399_v13 = vld [vmem:[#allocation8 + $0x158] sm:$0xff]  ;;  %v659_v15 = vld [vmem:[%s1327_s4] ss:$0 sm:$0xff]  ;;  %v507_v30 = vld [vmem:[#allocation9 + $0x30] sm:$0xff] }
  0x5b   :  { %v991_v14 = vpack.c.bf16 %v399_v13, %v398_v12  ;;  %v504_v23 = vld [vmem:[#allocation9 + $0x18] sm:$0xff]  ;;  %v505_v27 = vld [vmem:[#allocation9 + $0x20] sm:$0xff]  ;;  %v510_v34 = vld [vmem:[#allocation9 + $0x48] sm:$0xff] }
  0x5c   :  { %950 = vmatpush3.bf16.msra.mxu0 %v947_v37  ;;  %v508_v31 = vld [vmem:[#allocation9 + $0x38] sm:$0xff]  ;;  %v509_v33 = vld [vmem:[#allocation9 + $0x40] sm:$0xff]  ;;  %v511_v36 = vld [vmem:[#allocation9 + $0x50] sm:$0xff] }
  0x5d   :  { %922 = vmatpush3.bf16.msra.mxu1 %v919_v16  ;;  %952 = vmatprep.subr.bf16.mxu0 %v951_v40  ;;  %v1015_v32 = vpack.c.bf16 %v508_v31, %v507_v30  ;;  %v1019_v35 = vpack.c.bf16 %v510_v34, %v509_v33  ;;  %v512_v37 = vld [vmem:[#allocation9 + $0x58] sm:$0xff]  ;;  %v513_v39 = vld [vmem:[#allocation9 + $0x60] sm:$0xff]  ;;  %v515_v42 = vld [vmem:[#allocation9 + $0x70] sm:$0xff] }
  0x5e   :  { %924 = vmatprep.subr.bf16.mxu1 %v923_v19  ;;  %v1023_v38 = vpack.c.bf16 %v512_v37, %v511_v36  ;;  %v400_v45 = vld [vmem:[#allocation8 + $0x160] sm:$0xff] }
  0x5f   :  { %v661_v52 = vld [vmem:[%s1327_s4 + $0x1] ss:$0 sm:$0xff] }
  0x60   :  { %954 = vmatpush3.bf16.msra.mxu0 %v951_v40  ;;  %v514_v40 = vld [vmem:[#allocation9 + $0x68] sm:$0xff] }
  0x61   :  { %926 = vmatpush3.bf16.msra.mxu1 %v923_v19  ;;  %956 = vmatprep.subr.bf16.mxu0 %v955_v43  ;;  %v1027_v41 = vpack.c.bf16 %v514_v40, %v513_v39 }
  0x62   :  { %928 = vmatprep.subr.bf16.mxu1 %v927_v22 }
  0x64   :  { %958 = vmatpush3.bf16.msra.mxu0 %v955_v43  ;;  %v516_v43 = vld [vmem:[#allocation9 + $0x78] sm:$0xff] }
  0x65   :  { %930 = vmatpush3.bf16.msra.mxu1 %v927_v22  ;;  %960 = vmatprep.subr.bf16.mxu0 %v959_v46  ;;  %v503_v22 = vld [vmem:[#allocation9 + $0x10] sm:$0xff]  ;;  %v1031_v44 = vpack.c.bf16 %v516_v43, %v515_v42 }
  0x66   :  { %932 = vmatprep.subr.bf16.mxu1 %v931_v25  ;;  %v1007_v26 = vpack.c.bf16 %v504_v23, %v503_v22 }
  0x68   :  { %962 = vmatpush3.bf16.msra.mxu0 %v959_v46  ;;  %v401_v46 = vld [vmem:[#allocation8 + $0x168] sm:$0xff] }
  0x69   :  { %934 = vmatpush3.bf16.msra.mxu1 %v931_v25  ;;  %964 = vmatprep.subr.bf16.mxu0 %v963_v54 }
  0x6a   :  { %936 = vmatprep.subr.bf16.mxu1 %v935_v28 }
  0x6c   :  { %966 = vmatpush3.bf16.msra.mxu0 %v963_v54 }
  0x6d   :  { %938 = vmatpush3.bf16.msra.mxu1 %v935_v28  ;;  %968 = vmatprep.subr.bf16.mxu0 %v967_v57  ;;  %v506_v28 = vld [vmem:[#allocation9 + $0x28] sm:$0xff] }
  0x6e   :  { %972 = vmatprep.subr.bf16.mxu1 %v971_v0  ;;  %v1011_v29 = vpack.c.bf16 %v506_v28, %v505_v27 }
  0x70   :  { %970 = vmatpush3.bf16.msra.mxu0 %v967_v57 }
  0x71   :  { %1004 = vmatprep.subr.bf16.mxu0 %v1003_v60 }
 0x123   :  { %v753_v48 = vpop.f32.mrb[0].mxu1 }
 0x124   :  { %v166_v49 = vpop.f32.mrb[1].mxu1  ;;  %v1288_v51 = vadd.f32 %v753_v48, %v656_v47  ;;  %v402_v48 = vld [vmem:[#allocation8 + $0x170] sm:$0xff] }
 0x125   :  { %v1286_v50 = vadd.f32 %v656_v47, %v166_v49  ;;  %v995_v47 = vpack.c.bf16 %v401_v46, %v400_v45  ;;  %v403_v49 = vld [vmem:[#allocation8 + $0x178] sm:$0xff] }
 0x127   :  { %786 = vmatprep.mubr.f32.mxu1 %v1286_v50 }
 0x128   :  { %787 = vmatmul.mubr.f32.vlgmr.msra.gmra.mrb[2].mxu1 %v1288_v51 }
 0x129   :  { %974 = vmatpush3.bf16.msra.mxu1 %v971_v0 }
 0x12a   :  { %976 = vmatprep.subr.bf16.mxu1 %v975_v2 }
 0x12d   :  { %978 = vmatpush3.bf16.msra.mxu1 %v975_v2 }
 0x12e   :  { %980 = vmatprep.subr.bf16.mxu1 %v979_v5 }
 0x131   :  { %982 = vmatpush3.bf16.msra.mxu1 %v979_v5  ;;  %v663_v5 = vld [vmem:[%s1327_s4 + $0x2] ss:$0 sm:$0xff] }
 0x132   :  { %984 = vmatprep.subr.bf16.mxu1 %v983_v8 }
 0x135   :  { %986 = vmatpush3.bf16.msra.mxu1 %v983_v8 }
 0x136   :  { %988 = vmatprep.subr.bf16.mxu1 %v987_v11 }
 0x139   :  { %990 = vmatpush3.bf16.msra.mxu1 %v987_v11 }
 0x13a   :  { %992 = vmatprep.subr.bf16.mxu1 %v991_v14 }
 0x13d   :  { %994 = vmatpush3.bf16.msra.mxu1 %v991_v14 }
 0x13e   :  { %996 = vmatprep.subr.bf16.mxu1 %v995_v47 }
 0x141   :  { %998 = vmatpush3.bf16.msra.mxu1 %v995_v47 }
 0x1fb   :  { %v788_v16 = vpop.f32.mrb[2].mxu1 }
 0x1fc   :  { %v272_v17 = vadd.f32 %v788_v16, %v659_v15  ;;  %v266_v18 = vpop.f32.mrb[3].mxu1 }
 0x1fd   :  { %v267_v19 = vadd.f32 %v659_v15, %v266_v18 }
 0x1fe   :  { %v276_v20 = vmax.f32 %v272_v17, 0.0 }
 0x1ff   :  { %v275_v21 = vmax.f32 %v267_v19, 0.0 }
 0x200   :  { %v278_v25 = vadd.f32 %v276_v20, %v1288_v51 }
 0x201   :  { %v277_v24 = vadd.f32 %v275_v21, %v1286_v50 }
 0x203   :  { %821 = vmatprep.mubr.f32.mxu0 %v277_v24 }
 0x204   :  { %822 = vmatmul.mubr.f32.vlgmr.msra.gmra.mrb[0].mxu0 %v278_v25 }
 0x205   :  { %1006 = vmatpush3.bf16.msra.mxu0 %v1003_v60  ;;  %891 = vmatprep.mubr.f32.mxu0 %v1286_v50  ;;  %v999_v50 = vpack.c.bf16 %v403_v49, %v402_v48  ;;  %v664_v60 = vld [vmem:[%s1329_s6] ss:$0 sm:$0xff]  ;;  %s1166_s6 = smov [#allocation11]  }
 0x206   :  { %1008 = vmatprep.subr.bf16.mxu0 %v1007_v26  ;;  %s642_s12 = sshll.u32 %s1166_s6, 4  ;;  %s643_s12 = int_to_ptr.vmem [resolvable:$true] %s642_s12 }
 0x207   :  { %1000 = vmatprep.subr.bf16.mxu1 %v999_v50  ;;  %s1130_s4 = scalar_lea.vmem %s643_s12, 1024  ;;  %p1135_p5 = scmp.lt.s32.totalorder %s643_s12, %s643_s12 }
 0x208   :  { %1002 = vmatpush3.bf16.msra.mxu1 %v999_v50  ;;  %p1131_p4 = scmp.ne.s32.totalorder %s643_s12, %s1130_s4  ;;  %p1136_p6 = scmp.lt.s32.totalorder %s1130_s4, %s1130_s4 }
 0x209   :  { %1010 = vmatpush3.bf16.msra.mxu0 %v1007_v26 }
 0x20a   :  { %1012 = vmatprep.subr.bf16.mxu0 %v1011_v29  ;;  %p1137_p7 = por %p1136_p6, %p1135_p5 }
 0x20c   :  { %p1138_p8 = pnand %p1137_p7, %p1131_p4 }
 0x20d   :  { %1014 = vmatpush3.bf16.msra.mxu0 %v1011_v29 }
 0x20e   :  { %1016 = vmatprep.subr.bf16.mxu0 %v1015_v32 }
 0x211   :  { %1018 = vmatpush3.bf16.msra.mxu0 %v1015_v32 }
 0x212   :  { %1020 = vmatprep.subr.bf16.mxu0 %v1019_v35 }
 0x215   :  { %1022 = vmatpush3.bf16.msra.mxu0 %v1019_v35 }
 0x216   :  { %1024 = vmatprep.subr.bf16.mxu0 %v1023_v38 }
 0x219   :  { %1026 = vmatpush3.bf16.msra.mxu0 %v1023_v38 }
 0x21a   :  { %1028 = vmatprep.subr.bf16.mxu0 %v1027_v41 }
 0x21d   :  { %1030 = vmatpush3.bf16.msra.mxu0 %v1027_v41 }
 0x21e   :  { %1032 = vmatprep.subr.bf16.mxu0 %v1031_v44 }
 0x221   :  { %1034 = vmatpush3.bf16.msra.mxu0 %v1031_v44 }
 0x224   :  { %892 = vmatmul.mubr.f32.vlgmr.msra.gmra.mrb[2].mxu0 %v1288_v51 }
 0x225   :  { %894 = vmatprep.mubr.f32.mxu0 %v277_v24 }
 0x228   :  { %895 = vmatmul.mubr.f32.gmra.mrb[4].mxu0 %v278_v25 }
 0x2d7   :  { %v823_v53 = vpop.f32.mrb[0].mxu0 }
 0x2d8   :  { %v378_v54 = vadd.f32 %v823_v53, %v661_v52  ;;  %v372_v55 = vpop.f32.mrb[1].mxu0 }
 0x2d9   :  { %v373_v51 = vadd.f32 %v661_v52, %v372_v55 }
 0x2da   :  { %v382_v56 = vmax.f32 %v378_v54, 0.0 }
 0x2db   :  { %v381_v57 = vmax.f32 %v373_v51, 0.0 }
 0x2dc   :  { %v384_v59 = vadd.f32 %v382_v56, %v278_v25 }
 0x2dd   :  { %v383_v58 = vadd.f32 %v381_v57, %v277_v24 }
 0x2df   :  { %856 = vmatprep.mubr.f32.mxu1 %v383_v58  ;;  %897 = vmatprep.mubr.f32.mxu0 %v383_v58 }
 0x2e0   :  { %857 = vmatmul.mubr.f32.vlgmr.msra.gmra.mrb[4].mxu1 %v384_v59  ;;  %898 = vmatmul.mubr.f32.gmra.mrb[6].mxu0 %v384_v59 }
 0x2f7   :  { %v893_v61 = vpop.f32.mrb[2].mxu0 }
 0x2f8   :  { %v596_v62 = vadd.f32 %v893_v61, %v664_v60  ;;  %v590_v63 = vpop.f32.mrb[3].mxu0 }
 0x2f9   :  { %v591_v0 = vadd.f32 %v664_v60, %v590_v63 }
 0x2fa   :  { %630 = vst [vmem:[#allocation11 + $0x8] sm:$0xff] %v596_v62 }
 0x2fb   :  { %629 = vst [vmem:[#allocation11] sm:$0xff] %v591_v0  ;;  %v896_v1 = vpop.f32.mrb[4].mxu0 }
 0x2fc   :  { %v606_v2 = vadd.f32 %v896_v1, %v664_v60  ;;  %v600_v3 = vpop.f32.mrb[5].mxu0 }
 0x2fd   :  { %v601_v4 = vadd.f32 %v664_v60, %v600_v3 }
 0x2fe   :  { %632 = vst [vmem:[#allocation11 + $0x18] sm:$0xff] %v606_v2 }
 0x2ff   :  { %631 = vst [vmem:[#allocation11 + $0x10] sm:$0xff] %v601_v4 }
 0x3b3   :  { %v858_v6 = vpop.f32.mrb[4].mxu1  ;;  %v899_v7 = vpop.f32.mrb[6].mxu0 }
 0x3b4   :  { %v484_v8 = vadd.f32 %v858_v6, %v663_v5  ;;  %v616_v9 = vadd.f32 %v899_v7, %v664_v60  ;;  %v478_v10 = vpop.f32.mrb[5].mxu1  ;;  %v610_v11 = vpop.f32.mrb[7].mxu0 }
 0x3b5   :  { %v479_v12 = vadd.f32 %v663_v5, %v478_v10  ;;  %v611_v13 = vadd.f32 %v664_v60, %v610_v11 }
 0x3b6   :  { %v488_v14 = vmax.f32 %v484_v8, 0.0  ;;  %634 = vst [vmem:[#allocation11 + $0x28] sm:$0xff] %v616_v9 }
 0x3b7   :  { %v487_v15 = vmax.f32 %v479_v12, 0.0  ;;  %633 = vst [vmem:[#allocation11 + $0x20] sm:$0xff] %v611_v13 }
 0x3b8   :  { %v490_v17 = vadd.f32 %v488_v14, %v384_v59 }
 0x3b9   :  { %v489_v16 = vadd.f32 %v487_v15, %v383_v58 }
 0x3bb   :  { %900 = vmatprep.mubr.f32.mxu0 %v489_v16 }
 0x3bc   :  { %901 = vmatmul.mubr.f32.gmra.mrb[8].mxu0 %v490_v17 }
 0x48f   :  { %v902_v18 = vpop.f32.mrb[8].mxu0 }
 0x490   :  { %v626_v19 = vadd.f32 %v902_v18, %v664_v60  ;;  %v620_v20 = vpop.f32.mrb[9].mxu0 }
 0x491   :  { %v621_v21 = vadd.f32 %v664_v60, %v620_v20 }
 0x492   :  { %636 = vst [vmem:[#allocation11 + $0x38] sm:$0xff] %v626_v19 }
 0x493   :  { %635 = vst [vmem:[#allocation11 + $0x30] sm:$0xff] %v621_v21 }
 0x494   :  { %1141 = shalt.err (!%p1138_p8)
}
 0x495   :  { %s1142_s0 = scalar_lea.hbm %s1330_s7, 1024 }
 0x496   :  { %p1143_p9 = scmp.ne.s32.totalorder %s1330_s7, %s1142_s0  ;;  %p1146_p10 = scmp.lt.u32.totalorder %s1142_s0, %s1330_s7 }
 0x498   :  { %p1148_p11 = pnand %p1146_p10, %p1143_p9 }
 0x49a   :  { %1151 = shalt.err (!%p1148_p11)
}
 0x49b   :  { %648 = dma.vmem_to_hbm [thread:$0]  %s643_s12, 1024, %s1330_s7, [#allocation5], %s1162_s13, %s1162_s13, %s1163_s14  }
 0x49c   :  { %1158 = dma.done.wait [#allocation5], 1024  }
 0x49d   :  { %1159 = vsyncadd [#allocation5], 4294966272 }
 0x49e   :  { %652 = vsyncpa [#allocation4], 1 }
 0x49f   :  { %653 = vsyncpa [#allocation7], 1 }
 0x4a0   :  { %654 = vsyncpa [#allocation10], 1 }
 0x4a1   :  { %655 = vsyncpa [#allocation5], 1 }

</bundles_post_ra>
